<compile_context>
chip_gen: v5e
topology: v5e:2x2
jax: 0.10.0
libtpu: 0.0.40
codegen_flags: <defaults>
</compile_context>

<pallas_src>
import math
import functools

import jax
import jax.numpy as jnp
from jax import lax
from jax.experimental import pallas as pl
from jax.experimental.pallas import tpu as pltpu


def _cross_attention_kernel(x_ref, y_ref,
                            wq_ref, bq_ref,
                            wk_ref, bk_ref,
                            wv_ref, bv_ref,
                            wo_ref, bo_ref,
                            o_ref,
                            k_scr, v_scr, attn_scr,
                            *, n_heads: int, d_head: int):
    qi = pl.program_id(1)
    scale = 1.0 / math.sqrt(d_head)
    cdt = x_ref.dtype  # compute dtype (bf16 stays bf16; MXU accumulates in f32)

    # --- K/V projections: once per batch element, resident in scratch across all q-tiles ---
    @pl.when(qi == 0)
    def _():
        y = y_ref[0]                                                         # (Skv, d_ctx)
        k = jnp.dot(y, wk_ref[...], preferred_element_type=jnp.float32) + bk_ref[...]
        v = jnp.dot(y, wv_ref[...], preferred_element_type=jnp.float32) + bv_ref[...]
        k_scr[...] = k.astype(k_scr.dtype)
        v_scr[...] = v.astype(v_scr.dtype)

    # --- Q projection for this q-tile (1/sqrt(d_head) folded in once, in f32, pre-cast) ---
    x = x_ref[0]                                                             # (tq, d_embed)
    q = jnp.dot(x, wq_ref[...], preferred_element_type=jnp.float32) + bq_ref[...]
    q = (q * scale).astype(cdt)

    # --- per-head scaled-dot-product attention, written straight into the attn scratch slab ---
    for h in range(n_heads):
        lo = h * d_head
        qh = q[:, lo:lo + d_head]                                            # (tq,  d_head)
        kh = k_scr[:, lo:lo + d_head]                                        # (Skv, d_head)
        vh = v_scr[:, lo:lo + d_head]                                        # (Skv, d_head)

        # Contract over d_head directly — no explicit kh.T (avoids an XLU transpose per head).
        s = lax.dot_general(qh, kh, (((1,), (1,)), ((), ())),
                            preferred_element_type=jnp.float32)              # (tq, Skv)
        s = s - jnp.max(s, axis=-1, keepdims=True)
        p = jnp.exp(s)
        inv = pl.reciprocal(jnp.sum(p, axis=-1, keepdims=True), approx=True)  # EUP, not VALU div
        p = (p * inv).astype(vh.dtype)

        attn_scr[:, lo:lo + d_head] = jnp.dot(
            p, vh, preferred_element_type=jnp.float32).astype(attn_scr.dtype)

    # --- output projection (wo/bo are lane-padded to a multiple of 128 by the wrapper) ---
    out = jnp.dot(attn_scr[...], wo_ref[...],
                  preferred_element_type=jnp.float32) + bo_ref[...]
    o_ref[0] = out.astype(o_ref.dtype)


def _pick_q_tile(sq: int, preferred: int) -> int:
    """Largest q-tile <= `preferred` that evenly divides Sq (falls back to full Sq)."""
    if sq <= preferred:
        return sq
    for t in (preferred, 512, 256, 128, 64, 32, 16, 8):
        if t <= sq and sq % t == 0:
            return t
    return sq


def cross_attention(x, y, params, *, n_heads: int, q_tile: int = 256):
    """x: (B, Sq, d_embed); y: (B, Skv, d_context). Returns (B, Sq, d_embed).

    q_tile: 256 matches the 256x256 MXU on v6e/v7x; pass 128 on v5e.
    """
    B, Sq, d_embed = x.shape
    _, Skv, d_context = y.shape
    assert d_embed % n_heads == 0
    d_head = d_embed // n_heads

    wq, bq, wk, bk, wv, bv, wo, bo = params  # w*: (in, out), b*: (1, out)

    tq = _pick_q_tile(Sq, q_tile)
    n_qt = Sq // tq

    # Lane-dense output store: pad the out-projection width up to a multiple of 128 so the
    # final store is an unmasked vst; the padding is sliced off after the pallas_call.
    d_out = ((d_embed + 127) // 128) * 128
    if d_out != d_embed:
        wo = jnp.pad(wo, ((0, 0), (0, d_out - d_embed)))
        bo = jnp.pad(bo, ((0, 0), (0, d_out - d_embed)))

    kernel = functools.partial(_cross_attention_kernel, n_heads=n_heads, d_head=d_head)

    # Weights/biases: full 2-D blocks, constant block index => fetched once, never re-DMA'd.
    def wspec(a):
        return pl.BlockSpec(a.shape, lambda i, j: (0, 0))

    out = pl.pallas_call(
        kernel,
        out_shape=jax.ShapeDtypeStruct((B, Sq, d_out), x.dtype),
        grid_spec=pltpu.PrefetchScalarGridSpec(
            num_scalar_prefetch=0,
            grid=(B, n_qt),
            in_specs=[
                pl.BlockSpec((1, tq, d_embed), lambda i, j: (i, j, 0)),     # x (q-tiled)
                pl.BlockSpec((1, Skv, d_context), lambda i, j: (i, 0, 0)),  # y (per batch)
                wspec(wq), wspec(bq),
                wspec(wk), wspec(bk),
                wspec(wv), wspec(bv),
                wspec(wo), wspec(bo),
            ],
            out_specs=pl.BlockSpec((1, tq, d_out), lambda i, j: (i, j, 0)),
            scratch_shapes=[
                pltpu.VMEM((Skv, d_embed), x.dtype),   # K projection (resident across q-tiles)
                pltpu.VMEM((Skv, d_embed), x.dtype),   # V projection (resident across q-tiles)
                pltpu.VMEM((tq, d_embed), x.dtype),    # per-tile attention slab (pre out-proj)
            ],
        ),
        compiler_params=pltpu.CompilerParams(
            dimension_semantics=("parallel", "arbitrary"),  # batch sharded across TCs on v7x
            vmem_limit_bytes=48 * 1024 * 1024,              # below v7x's 64 MiB physical VMEM
        ),
    )(x, y, wq, bq, wk, bk, wv, bv, wo, bo)

    if d_out != d_embed:
        out = out[..., :d_embed]
    return out


def _reference(x, y, params, n_heads):
    """Pure-JAX reference mirroring the PyTorch forward exactly."""
    wq, bq, wk, bk, wv, bv, wo, bo = params
    B, Sq, d_embed = x.shape
    d_head = d_embed // n_heads
    q = x @ wq + bq
    k = y @ wk + bk
    v = y @ wv + bv

    def split(t):
        return t.reshape(B, -1, n_heads, d_head).transpose(0, 2, 1, 3)

    q, k, v = split(q), split(k), split(v)
    att = jnp.einsum('bhqd,bhkd->bhqk', q, k) / math.sqrt(d_head)
    att = jax.nn.softmax(att, axis=-1)
    o = jnp.einsum('bhqk,bhkd->bhqd', att, v)
    o = o.transpose(0, 2, 1, 3).reshape(B, Sq, d_embed)
    return o @ wo + bo


if __name__ == "__main__":
    # Small shapes consistent with the module's forward.
    B, Sq, Skv = 2, 16, 8
    n_heads, d_embed, d_context = 4, 32, 24

    key = jax.random.PRNGKey(0)
    ks = jax.random.split(key, 10)

    x = jax.random.normal(ks[0], (B, Sq, d_embed), dtype=jnp.float32)
    y = jax.random.normal(ks[1], (B, Skv, d_context), dtype=jnp.float32)

    # Deterministic param init (PyTorch Linear weight (out,in) -> stored transposed (in,out)).
    def lin(k, d_in, d_out, scale):
        kw, kb = jax.random.split(k)
        w = jax.random.uniform(kw, (d_in, d_out), jnp.float32, -scale, scale)
        b = jax.random.uniform(kb, (1, d_out), jnp.float32, -scale, scale)
        return w, b

    wq, bq = lin(ks[2], d_embed, d_embed, 1.0 / math.sqrt(d_embed))
    wk, bk = lin(ks[3], d_context, d_embed, 1.0 / math.sqrt(d_context))
    wv, bv = lin(ks[4], d_context, d_embed, 1.0 / math.sqrt(d_context))
    wo, bo = lin(ks[5], d_embed, d_embed, 1.0 / math.sqrt(d_embed))
    params = (wq, bq, wk, bk, wv, bv, wo, bo)

    out = cross_attention(x, y, params, n_heads=n_heads)
    out = jax.block_until_ready(out)

    ref = _reference(x, y, params, n_heads)
    assert out.shape == (B, Sq, d_embed)
    # Tolerance loosened slightly vs the pure-f32 reference because the kernel uses the
    # EUP approximate reciprocal for the softmax denominator.
    assert jnp.allclose(out, ref, atol=1e-2, rtol=1e-2), "mismatch vs reference"

    print("KERNEL_OK")
</pallas_src>

<mosaic_0001>
module attributes {stable_mosaic.version = 11 : i64} {
  func.func @_cross_attention_kernel(%arg0: i32, %arg1: i32, %arg2: memref<1x16x32xf32, #tpu.memory_space<vmem>>, %arg3: memref<1x8x24xf32, #tpu.memory_space<vmem>>, %arg4: memref<32x32xf32, #tpu.memory_space<vmem>>, %arg5: memref<1x32xf32, #tpu.memory_space<vmem>>, %arg6: memref<24x32xf32, #tpu.memory_space<vmem>>, %arg7: memref<1x32xf32, #tpu.memory_space<vmem>>, %arg8: memref<24x32xf32, #tpu.memory_space<vmem>>, %arg9: memref<1x32xf32, #tpu.memory_space<vmem>>, %arg10: memref<32x128xf32, #tpu.memory_space<vmem>>, %arg11: memref<1x128xf32, #tpu.memory_space<vmem>>, %arg12: memref<1x16x128xf32, #tpu.memory_space<vmem>>, %arg13: memref<8x32xf32, #tpu.memory_space<vmem>>, %arg14: memref<8x32xf32, #tpu.memory_space<vmem>>, %arg15: memref<16x32xf32, #tpu.memory_space<vmem>>) attributes {dimension_semantics = [#tpu.dimension_semantics<parallel>, #tpu.dimension_semantics<arbitrary>], iteration_bounds = array<i64: 2, 1>, scalar_prefetch = 0 : i64, scratch_operands = 3 : i64, tpu.core_type = #tpu.core_type<tc>, window_params = [{transform_indices = @transform_0, window_bounds = array<i64: 1, 16, 32>}, {transform_indices = @transform_1, window_bounds = array<i64: 1, 8, 24>}, {pipeline_mode = #tpu.pipeline_mode<synchronous>, transform_indices = @transform_2, window_bounds = array<i64: 32, 32>}, {pipeline_mode = #tpu.pipeline_mode<synchronous>, transform_indices = @transform_3, window_bounds = array<i64: 1, 32>}, {pipeline_mode = #tpu.pipeline_mode<synchronous>, transform_indices = @transform_4, window_bounds = array<i64: 24, 32>}, {pipeline_mode = #tpu.pipeline_mode<synchronous>, transform_indices = @transform_5, window_bounds = array<i64: 1, 32>}, {pipeline_mode = #tpu.pipeline_mode<synchronous>, transform_indices = @transform_6, window_bounds = array<i64: 24, 32>}, {pipeline_mode = #tpu.pipeline_mode<synchronous>, transform_indices = @transform_7, window_bounds = array<i64: 1, 32>}, {pipeline_mode = #tpu.pipeline_mode<synchronous>, transform_indices = @transform_8, window_bounds = array<i64: 32, 128>}, {pipeline_mode = #tpu.pipeline_mode<synchronous>, transform_indices = @transform_9, window_bounds = array<i64: 1, 128>}, {transform_indices = @transform_10, window_bounds = array<i64: 1, 16, 128>}]} {
    %c0_i32 = arith.constant 0 : i32
    %0 = arith.cmpi eq, %arg1, %c0_i32 : i32
    %1 = arith.extui %0 : i1 to i32
    %c0_i32_0 = arith.constant 0 : i32
    %2 = arith.cmpi ne, %1, %c0_i32_0 : i32
    scf.if %2 {
      %c0_55 = arith.constant 0 : index
      %c0_56 = arith.constant 0 : index
      %c0_57 = arith.constant 0 : index
      %85 = vector.load %arg3[%c0_55, %c0_56, %c0_57] : memref<1x8x24xf32, #tpu.memory_space<vmem>>, vector<1x8x24xf32>
      %86 = vector.shape_cast %85 : vector<1x8x24xf32> to vector<8x24xf32>
      %c0_58 = arith.constant 0 : index
      %c0_59 = arith.constant 0 : index
      %87 = vector.load %arg6[%c0_58, %c0_59] : memref<24x32xf32, #tpu.memory_space<vmem>>, vector<24x32xf32>
      %cst_60 = arith.constant dense<0.000000e+00> : vector<8x32xf32>
      %88 = tpu.matmul %86, %87, %cst_60 {dimension_numbers = #tpu.dot_dimension_numbers<[1], [0], [0], [1], [0, 0, 1, 1], [], []>} : vector<8x24xf32>, vector<24x32xf32>, vector<8x32xf32> -> vector<8x32xf32>
      %c0_61 = arith.constant 0 : index
      %c0_62 = arith.constant 0 : index
      %89 = vector.load %arg7[%c0_61, %c0_62] : memref<1x32xf32, #tpu.memory_space<vmem>>, vector<1x32xf32>
      %90 = vector.broadcast %89 : vector<1x32xf32> to vector<8x32xf32>
      %91 = arith.addf %88, %90 : vector<8x32xf32>
      %c0_63 = arith.constant 0 : index
      %c0_64 = arith.constant 0 : index
      %92 = vector.load %arg8[%c0_63, %c0_64] : memref<24x32xf32, #tpu.memory_space<vmem>>, vector<24x32xf32>
      %cst_65 = arith.constant dense<0.000000e+00> : vector<8x32xf32>
      %93 = tpu.matmul %86, %92, %cst_65 {dimension_numbers = #tpu.dot_dimension_numbers<[1], [0], [0], [1], [0, 0, 1, 1], [], []>} : vector<8x24xf32>, vector<24x32xf32>, vector<8x32xf32> -> vector<8x32xf32>
      %c0_66 = arith.constant 0 : index
      %c0_67 = arith.constant 0 : index
      %94 = vector.load %arg9[%c0_66, %c0_67] : memref<1x32xf32, #tpu.memory_space<vmem>>, vector<1x32xf32>
      %95 = vector.broadcast %94 : vector<1x32xf32> to vector<8x32xf32>
      %96 = arith.addf %93, %95 : vector<8x32xf32>
      %c0_68 = arith.constant 0 : index
      %c0_69 = arith.constant 0 : index
      %97 = vector.load %arg13[%c0_68, %c0_69] : memref<8x32xf32, #tpu.memory_space<vmem>>, vector<8x32xf32>
      tpu.vector_store %arg13[%c0_68, %c0_69], %91 {strides = array<i32>} : memref<8x32xf32, #tpu.memory_space<vmem>>, vector<8x32xf32>,
      %c0_70 = arith.constant 0 : index
      %c0_71 = arith.constant 0 : index
      %98 = vector.load %arg14[%c0_70, %c0_71] : memref<8x32xf32, #tpu.memory_space<vmem>>, vector<8x32xf32>
      tpu.vector_store %arg14[%c0_70, %c0_71], %96 {strides = array<i32>} : memref<8x32xf32, #tpu.memory_space<vmem>>, vector<8x32xf32>,
    } else {
    }
    %c0 = arith.constant 0 : index
    %c0_1 = arith.constant 0 : index
    %c0_2 = arith.constant 0 : index
    %3 = vector.load %arg2[%c0, %c0_1, %c0_2] : memref<1x16x32xf32, #tpu.memory_space<vmem>>, vector<1x16x32xf32>
    %4 = vector.shape_cast %3 : vector<1x16x32xf32> to vector<16x32xf32>
    %c0_3 = arith.constant 0 : index
    %c0_4 = arith.constant 0 : index
    %5 = vector.load %arg4[%c0_3, %c0_4] : memref<32x32xf32, #tpu.memory_space<vmem>>, vector<32x32xf32>
    %cst = arith.constant dense<0.000000e+00> : vector<16x32xf32>
    %6 = tpu.matmul %4, %5, %cst {dimension_numbers = #tpu.dot_dimension_numbers<[1], [0], [0], [1], [0, 0, 1, 1], [], []>} : vector<16x32xf32>, vector<32x32xf32>, vector<16x32xf32> -> vector<16x32xf32>
    %c0_5 = arith.constant 0 : index
    %c0_6 = arith.constant 0 : index
    %7 = vector.load %arg5[%c0_5, %c0_6] : memref<1x32xf32, #tpu.memory_space<vmem>>, vector<1x32xf32>
    %8 = vector.broadcast %7 : vector<1x32xf32> to vector<16x32xf32>
    %9 = arith.addf %6, %8 : vector<16x32xf32>
    %cst_7 = arith.constant 0.353553385 : f32
    %10 = vector.broadcast %cst_7 : f32 to vector<16x32xf32>
    %11 = arith.mulf %9, %10 : vector<16x32xf32>
    %12 = vector.extract_strided_slice %11 {offsets = [0, 0], sizes = [16, 8], strides = [1, 1]} : vector<16x32xf32> to vector<16x8xf32>
    %c0_8 = arith.constant 0 : index
    %c0_9 = arith.constant 0 : index
    %13 = vector.load %arg13[%c0_8, %c0_9] : memref<8x32xf32, #tpu.memory_space<vmem>>, vector<8x8xf32>
    %c0_10 = arith.constant 0 : index
    %c0_11 = arith.constant 0 : index
    %14 = vector.load %arg14[%c0_10, %c0_11] : memref<8x32xf32, #tpu.memory_space<vmem>>, vector<8x8xf32>
    %cst_12 = arith.constant dense<0.000000e+00> : vector<16x8xf32>
    %15 = tpu.matmul %12, %13, %cst_12 {dimension_numbers = #tpu.dot_dimension_numbers<[1], [1], [0], [0], [0, 0, 1, 0], [], []>} : vector<16x8xf32>, vector<8x8xf32>, vector<16x8xf32> -> vector<16x8xf32>
    %cst_13 = arith.constant dense<0xFF800000> : vector<16xf32>
    %16 = vector.multi_reduction <maximumf>, %15, %cst_13 [1] : vector<16x8xf32> to vector<16xf32>
    %17 = vector.shape_cast %16 : vector<16xf32> to vector<16x1xf32>
    %18 = vector.broadcast %17 : vector<16x1xf32> to vector<16x8xf32>
    %19 = arith.subf %15, %18 : vector<16x8xf32>
    %20 = math.exp %19 : vector<16x8xf32>
    %cst_14 = arith.constant dense<0.000000e+00> : vector<16xf32>
    %21 = vector.multi_reduction <add>, %20, %cst_14 [1] : vector<16x8xf32> to vector<16xf32>
    %22 = vector.shape_cast %21 : vector<16xf32> to vector<16x1xf32>
    %23 = tpu.reciprocal %22 {approx = true} : vector<16x1xf32> -> vector<16x1xf32>
    %24 = vector.broadcast %23 : vector<16x1xf32> to vector<16x8xf32>
    %25 = arith.mulf %20, %24 : vector<16x8xf32>
    %cst_15 = arith.constant dense<0.000000e+00> : vector<16x8xf32>
    %26 = tpu.matmul %25, %14, %cst_15 {dimension_numbers = #tpu.dot_dimension_numbers<[1], [0], [0], [1], [0, 0, 1, 1], [], []>} : vector<16x8xf32>, vector<8x8xf32>, vector<16x8xf32> -> vector<16x8xf32>
    %c0_16 = arith.constant 0 : index
    %c0_17 = arith.constant 0 : index
    %27 = vector.load %arg15[%c0_16, %c0_17] : memref<16x32xf32, #tpu.memory_space<vmem>>, vector<16x8xf32>
    tpu.vector_store %arg15[%c0_16, %c0_17], %26 {strides = array<i32>} : memref<16x32xf32, #tpu.memory_space<vmem>>, vector<16x8xf32>,
    %28 = vector.extract_strided_slice %11 {offsets = [0, 8], sizes = [16, 8], strides = [1, 1]} : vector<16x32xf32> to vector<16x8xf32>
    %c0_18 = arith.constant 0 : index
    %c8 = arith.constant 8 : index
    %29 = vector.load %arg13[%c0_18, %c8] : memref<8x32xf32, #tpu.memory_space<vmem>>, vector<8x8xf32>
    %c0_19 = arith.constant 0 : index
    %c8_20 = arith.constant 8 : index
    %30 = vector.load %arg14[%c0_19, %c8_20] : memref<8x32xf32, #tpu.memory_space<vmem>>, vector<8x8xf32>
    %cst_21 = arith.constant dense<0.000000e+00> : vector<16x8xf32>
    %31 = tpu.matmul %28, %29, %cst_21 {dimension_numbers = #tpu.dot_dimension_numbers<[1], [1], [0], [0], [0, 0, 1, 0], [], []>} : vector<16x8xf32>, vector<8x8xf32>, vector<16x8xf32> -> vector<16x8xf32>
    %cst_22 = arith.constant dense<0xFF800000> : vector<16xf32>
    %32 = vector.multi_reduction <maximumf>, %31, %cst_22 [1] : vector<16x8xf32> to vector<16xf32>
    %33 = vector.shape_cast %32 : vector<16xf32> to vector<16x1xf32>
    %34 = vector.broadcast %33 : vector<16x1xf32> to vector<16x8xf32>
    %35 = arith.subf %31, %34 : vector<16x8xf32>
    %36 = math.exp %35 : vector<16x8xf32>
    %cst_23 = arith.constant dense<0.000000e+00> : vector<16xf32>
    %37 = vector.multi_reduction <add>, %36, %cst_23 [1] : vector<16x8xf32> to vector<16xf32>
    %38 = vector.shape_cast %37 : vector<16xf32> to vector<16x1xf32>
    %39 = tpu.reciprocal %38 {approx = true} : vector<16x1xf32> -> vector<16x1xf32>
    %40 = vector.broadcast %39 : vector<16x1xf32> to vector<16x8xf32>
    %41 = arith.mulf %36, %40 : vector<16x8xf32>
    %cst_24 = arith.constant dense<0.000000e+00> : vector<16x8xf32>
    %42 = tpu.matmul %41, %30, %cst_24 {dimension_numbers = #tpu.dot_dimension_numbers<[1], [0], [0], [1], [0, 0, 1, 1], [], []>} : vector<16x8xf32>, vector<8x8xf32>, vector<16x8xf32> -> vector<16x8xf32>
    %c0_25 = arith.constant 0 : index
    %c8_26 = arith.constant 8 : index
    %43 = vector.load %arg15[%c0_25, %c8_26] : memref<16x32xf32, #tpu.memory_space<vmem>>, vector<16x8xf32>
    tpu.vector_store %arg15[%c0_25, %c8_26], %42 {strides = array<i32>} : memref<16x32xf32, #tpu.memory_space<vmem>>, vector<16x8xf32>,
    %44 = vector.extract_strided_slice %11 {offsets = [0, 16], sizes = [16, 8], strides = [1, 1]} : vector<16x32xf32> to vector<16x8xf32>
    %c0_27 = arith.constant 0 : index
    %c16 = arith.constant 16 : index
    %45 = vector.load %arg13[%c0_27, %c16] : memref<8x32xf32, #tpu.memory_space<vmem>>, vector<8x8xf32>
    %c0_28 = arith.constant 0 : index
    %c16_29 = arith.constant 16 : index
    %46 = vector.load %arg14[%c0_28, %c16_29] : memref<8x32xf32, #tpu.memory_space<vmem>>, vector<8x8xf32>
    %cst_30 = arith.constant dense<0.000000e+00> : vector<16x8xf32>
    %47 = tpu.matmul %44, %45, %cst_30 {dimension_numbers = #tpu.dot_dimension_numbers<[1], [1], [0], [0], [0, 0, 1, 0], [], []>} : vector<16x8xf32>, vector<8x8xf32>, vector<16x8xf32> -> vector<16x8xf32>
    %cst_31 = arith.constant dense<0xFF800000> : vector<16xf32>
    %48 = vector.multi_reduction <maximumf>, %47, %cst_31 [1] : vector<16x8xf32> to vector<16xf32>
    %49 = vector.shape_cast %48 : vector<16xf32> to vector<16x1xf32>
    %50 = vector.broadcast %49 : vector<16x1xf32> to vector<16x8xf32>
    %51 = arith.subf %47, %50 : vector<16x8xf32>
    %52 = math.exp %51 : vector<16x8xf32>
    %cst_32 = arith.constant dense<0.000000e+00> : vector<16xf32>
    %53 = vector.multi_reduction <add>, %52, %cst_32 [1] : vector<16x8xf32> to vector<16xf32>
    %54 = vector.shape_cast %53 : vector<16xf32> to vector<16x1xf32>
    %55 = tpu.reciprocal %54 {approx = true} : vector<16x1xf32> -> vector<16x1xf32>
    %56 = vector.broadcast %55 : vector<16x1xf32> to vector<16x8xf32>
    %57 = arith.mulf %52, %56 : vector<16x8xf32>
    %cst_33 = arith.constant dense<0.000000e+00> : vector<16x8xf32>
    %58 = tpu.matmul %57, %46, %cst_33 {dimension_numbers = #tpu.dot_dimension_numbers<[1], [0], [0], [1], [0, 0, 1, 1], [], []>} : vector<16x8xf32>, vector<8x8xf32>, vector<16x8xf32> -> vector<16x8xf32>
    %c0_34 = arith.constant 0 : index
    %c16_35 = arith.constant 16 : index
    %59 = vector.load %arg15[%c0_34, %c16_35] : memref<16x32xf32, #tpu.memory_space<vmem>>, vector<16x8xf32>
    tpu.vector_store %arg15[%c0_34, %c16_35], %58 {strides = array<i32>} : memref<16x32xf32, #tpu.memory_space<vmem>>, vector<16x8xf32>,
    %60 = vector.extract_strided_slice %11 {offsets = [0, 24], sizes = [16, 8], strides = [1, 1]} : vector<16x32xf32> to vector<16x8xf32>
    %c0_36 = arith.constant 0 : index
    %c24 = arith.constant 24 : index
    %61 = vector.load %arg13[%c0_36, %c24] : memref<8x32xf32, #tpu.memory_space<vmem>>, vector<8x8xf32>
    %c0_37 = arith.constant 0 : index
    %c24_38 = arith.constant 24 : index
    %62 = vector.load %arg14[%c0_37, %c24_38] : memref<8x32xf32, #tpu.memory_space<vmem>>, vector<8x8xf32>
    %cst_39 = arith.constant dense<0.000000e+00> : vector<16x8xf32>
    %63 = tpu.matmul %60, %61, %cst_39 {dimension_numbers = #tpu.dot_dimension_numbers<[1], [1], [0], [0], [0, 0, 1, 0], [], []>} : vector<16x8xf32>, vector<8x8xf32>, vector<16x8xf32> -> vector<16x8xf32>
    %cst_40 = arith.constant dense<0xFF800000> : vector<16xf32>
    %64 = vector.multi_reduction <maximumf>, %63, %cst_40 [1] : vector<16x8xf32> to vector<16xf32>
    %65 = vector.shape_cast %64 : vector<16xf32> to vector<16x1xf32>
    %66 = vector.broadcast %65 : vector<16x1xf32> to vector<16x8xf32>
    %67 = arith.subf %63, %66 : vector<16x8xf32>
    %68 = math.exp %67 : vector<16x8xf32>
    %cst_41 = arith.constant dense<0.000000e+00> : vector<16xf32>
    %69 = vector.multi_reduction <add>, %68, %cst_41 [1] : vector<16x8xf32> to vector<16xf32>
    %70 = vector.shape_cast %69 : vector<16xf32> to vector<16x1xf32>
    %71 = tpu.reciprocal %70 {approx = true} : vector<16x1xf32> -> vector<16x1xf32>
    %72 = vector.broadcast %71 : vector<16x1xf32> to vector<16x8xf32>
    %73 = arith.mulf %68, %72 : vector<16x8xf32>
    %cst_42 = arith.constant dense<0.000000e+00> : vector<16x8xf32>
    %74 = tpu.matmul %73, %62, %cst_42 {dimension_numbers = #tpu.dot_dimension_numbers<[1], [0], [0], [1], [0, 0, 1, 1], [], []>} : vector<16x8xf32>, vector<8x8xf32>, vector<16x8xf32> -> vector<16x8xf32>
    %c0_43 = arith.constant 0 : index
    %c24_44 = arith.constant 24 : index
    %75 = vector.load %arg15[%c0_43, %c24_44] : memref<16x32xf32, #tpu.memory_space<vmem>>, vector<16x8xf32>
    tpu.vector_store %arg15[%c0_43, %c24_44], %74 {strides = array<i32>} : memref<16x32xf32, #tpu.memory_space<vmem>>, vector<16x8xf32>,
    %c0_45 = arith.constant 0 : index
    %c0_46 = arith.constant 0 : index
    %76 = vector.load %arg15[%c0_45, %c0_46] : memref<16x32xf32, #tpu.memory_space<vmem>>, vector<16x32xf32>
    %c0_47 = arith.constant 0 : index
    %c0_48 = arith.constant 0 : index
    %77 = vector.load %arg10[%c0_47, %c0_48] : memref<32x128xf32, #tpu.memory_space<vmem>>, vector<32x128xf32>
    %cst_49 = arith.constant dense<0.000000e+00> : vector<16x128xf32>
    %78 = tpu.matmul %76, %77, %cst_49 {dimension_numbers = #tpu.dot_dimension_numbers<[1], [0], [0], [1], [0, 0, 1, 1], [], []>} : vector<16x32xf32>, vector<32x128xf32>, vector<16x128xf32> -> vector<16x128xf32>
    %c0_50 = arith.constant 0 : index
    %c0_51 = arith.constant 0 : index
    %79 = vector.load %arg11[%c0_50, %c0_51] : memref<1x128xf32, #tpu.memory_space<vmem>>, vector<1x128xf32>
    %80 = vector.broadcast %79 : vector<1x128xf32> to vector<16x128xf32>
    %81 = arith.addf %78, %80 : vector<16x128xf32>
    %c0_52 = arith.constant 0 : index
    %c0_53 = arith.constant 0 : index
    %c0_54 = arith.constant 0 : index
    %82 = vector.load %arg12[%c0_52, %c0_53, %c0_54] : memref<1x16x128xf32, #tpu.memory_space<vmem>>, vector<1x16x128xf32>
    %83 = vector.shape_cast %82 : vector<1x16x128xf32> to vector<16x128xf32>
    %84 = vector.shape_cast %81 : vector<16x128xf32> to vector<1x16x128xf32>
    tpu.vector_store %arg12[%c0_52, %c0_53, %c0_54], %84 {strides = array<i32>} : memref<1x16x128xf32, #tpu.memory_space<vmem>>, vector<1x16x128xf32>,
    return
  }
  func.func @transform_0(%arg0: i32, %arg1: i32) -> (i32, i32, i32) {
    %c0_i32 = arith.constant 0 : i32
    %c0_i32_0 = arith.constant 0 : i32
    return %arg0, %arg1, %c0_i32 : i32, i32, i32
  }
  func.func @transform_1(%arg0: i32, %arg1: i32) -> (i32, i32, i32) {
    %c0_i32 = arith.constant 0 : i32
    %c0_i32_0 = arith.constant 0 : i32
    %c0_i32_1 = arith.constant 0 : i32
    return %arg0, %c0_i32, %c0_i32_0 : i32, i32, i32
  }
  func.func @transform_2(%arg0: i32, %arg1: i32) -> (i32, i32) {
    %c0_i32 = arith.constant 0 : i32
    %c0_i32_0 = arith.constant 0 : i32
    %c0_i32_1 = arith.constant 0 : i32
    return %c0_i32, %c0_i32_0 : i32, i32
  }
  func.func @transform_3(%arg0: i32, %arg1: i32) -> (i32, i32) {
    %c0_i32 = arith.constant 0 : i32
    %c0_i32_0 = arith.constant 0 : i32
    %c0_i32_1 = arith.constant 0 : i32
    return %c0_i32, %c0_i32_0 : i32, i32
  }
  func.func @transform_4(%arg0: i32, %arg1: i32) -> (i32, i32) {
    %c0_i32 = arith.constant 0 : i32
    %c0_i32_0 = arith.constant 0 : i32
    %c0_i32_1 = arith.constant 0 : i32
    return %c0_i32, %c0_i32_0 : i32, i32
  }
  func.func @transform_5(%arg0: i32, %arg1: i32) -> (i32, i32) {
    %c0_i32 = arith.constant 0 : i32
    %c0_i32_0 = arith.constant 0 : i32
    %c0_i32_1 = arith.constant 0 : i32
    return %c0_i32, %c0_i32_0 : i32, i32
  }
  func.func @transform_6(%arg0: i32, %arg1: i32) -> (i32, i32) {
    %c0_i32 = arith.constant 0 : i32
    %c0_i32_0 = arith.constant 0 : i32
    %c0_i32_1 = arith.constant 0 : i32
    return %c0_i32, %c0_i32_0 : i32, i32
  }
  func.func @transform_7(%arg0: i32, %arg1: i32) -> (i32, i32) {
    %c0_i32 = arith.constant 0 : i32
    %c0_i32_0 = arith.constant 0 : i32
    %c0_i32_1 = arith.constant 0 : i32
    return %c0_i32, %c0_i32_0 : i32, i32
  }
  func.func @transform_8(%arg0: i32, %arg1: i32) -> (i32, i32) {
    %c0_i32 = arith.constant 0 : i32
    %c0_i32_0 = arith.constant 0 : i32
    %c0_i32_1 = arith.constant 0 : i32
    return %c0_i32, %c0_i32_0 : i32, i32
  }
  func.func @transform_9(%arg0: i32, %arg1: i32) -> (i32, i32) {
    %c0_i32 = arith.constant 0 : i32
    %c0_i32_0 = arith.constant 0 : i32
    %c0_i32_1 = arith.constant 0 : i32
    return %c0_i32, %c0_i32_0 : i32, i32
  }
  func.func @transform_10(%arg0: i32, %arg1: i32) -> (i32, i32, i32) {
    %c0_i32 = arith.constant 0 : i32
    %c0_i32_0 = arith.constant 0 : i32
    return %arg0, %arg1, %c0_i32 : i32, i32, i32
  }
}

</mosaic_0001>

<bundles_post_ra>
// kernel: tpu_custom_call.1
= control target key start
LH: loop header
LB: loop body
LE: loop exit
PB: predicated region body
PF: predicated region fallthrough
CT: control target
= control target key end

     0   :  { %s2068_s0 = inlined_call_operand.hbm [shape: f32[2,16,32], index: 0, kind: input, shape index: {}]   ;;  %s2069_s1 = inlined_call_operand.hbm [shape: f32[2,8,24], index: 1, kind: input, shape index: {}]   ;;  %s2070_s2 = inlined_call_operand.hbm [shape: f32[32,32], index: 2, kind: input, shape index: {}]   ;;  %s2071_s3 = inlined_call_operand.vmem [shape: f32[1,32], index: 3, kind: input, shape index: {}]   ;;  %s2072_s4 = inlined_call_operand.hbm [shape: f32[24,32], index: 4, kind: input, shape index: {}]   ;;  %s2073_s5 = inlined_call_operand.vmem [shape: f32[1,32], index: 5, kind: input, shape index: {}]   ;;  %s2074_s6 = inlined_call_operand.hbm [shape: f32[24,32], index: 6, kind: input, shape index: {}]   ;;  %s2075_s7 = inlined_call_operand.vmem [shape: f32[1,32], index: 7, kind: input, shape index: {}]   ;;  %s2076_s8 = inlined_call_operand.hbm [shape: f32[32,128], index: 8, kind: input, shape index: {}]   ;;  %s2077_s9 = inlined_call_operand.vmem [shape: f32[1,128], index: 9, kind: input, shape index: {}]   ;;  %s2078_s10 = inlined_call_operand.hbm [shape: f32[2,16,128], index: 10, kind: output, shape index: {}]  }
   0x1   :  { %2088 = sst [smem:[#allocation29_spill]] %s2070_s2 }
   0x2   :  { %2089 = sst [smem:[#allocation30_spill]] %s2072_s4 }
   0x3   :  { %2090 = sst [smem:[#allocation31_spill]] %s2074_s6 }
   0x4   :  { %2091 = sst [smem:[#allocation32_spill]] %s2076_s8 }
   0x5   :  { %2092 = sst [smem:[#allocation33_spill]] %s2078_s10 }
   0x6   :  { %15 = vsyncpa [#allocation6], 0 }
   0x7   :  { %17 = vsyncpa [#allocation6 + $0x1], 0 }
   0x8   :  { %18 = vsyncpa [#allocation9], 0 }
   0x9   :  { %20 = vsyncpa [#allocation9 + $0x1], 0 }
   0xa   :  { %21 = vsyncpa [#allocation12], 0 }
   0xb   :  { %22 = vsyncpa [#allocation15], 0 }
   0xc   :  { %23 = vsyncpa [#allocation7], 0 }
   0xd   :  { %25 = vsyncpa [#allocation7 + $0x1], 0  ;;  %s1779_s13 = smov 0   ;;  %s1781_s14 = smov 0  }
   0xe   :  { %s1783_s15 = smov 0   ;;  %s1785_s16 = smov 0  }
   0xf   :  { %s1787_s17 = smov 0   ;;  %s1789_s18 = smov 0  }
  0x10 LB: > { %2093 = sst [smem:[#allocation23_spill]] %s1689_s13  ;;  %s1810_s19 = sadd.s32 4294967295, %s1709_s18   ;;  %s1709_s18 = sphi %s1789_s18, %s31_s18   ;;  %s1705_s17 = sphi %s1787_s17, %s2122_s17   ;;  %s1701_s16 = sphi %s1785_s16, %s2121_s16   ;;  %s1697_s15 = sphi %s1783_s15, %s2120_s15   ;;  %s1693_s14 = sphi %s1781_s14, %s2119_s14   ;;  %s1689_s13 = sphi %s1779_s13, %s2118_s13  }
  0x11   : > { %2094 = sst [smem:[#allocation24_spill]] %s1697_s15  ;;  %s1221_s20 = sadd.s32 4294967294, %s1709_s18  }
  0x12   : > { %p65_p0 = scmp.ne.s32.totalorder %s1693_s14, %s1689_s13  ;;  %p66_p1 = scmp.eq.s32.totalorder %s1810_s19, 0 }
  0x13   : > { %p285_p2 = scmp.eq.s32.totalorder %s1810_s19, 1  ;;  %p291_p3 = scmp.eq.s32.totalorder %s1221_s20, 1 }
  0x14   : > { %p1819_p4 = por %p66_p1, %p65_p0  ;;  %p1222_p5 = scmp.ge.s32.totalorder %s1709_s18, 1 }
  0x15   : > { %p1824_p6 = por %p291_p3, %p65_p0  ;;  %p298_p7 = scmp.lt.s32.totalorder %s1709_s18, 3 }
  0x16   : > { %s2098_s2 = sld [smem:[#allocation29_spill]]  ;;  %s1711_s27 = smov [#allocation10]  }
  0x17   : > { %s2096_s22 = scalar_select %p1824_p6, 1, 0 }
  0x18   : > { %p1832_p8 = pnand %p1222_p5, %p298_p7  ;;  %s311_s28 = sshll.u32 %s1711_s27, 4  ;;  %s312_s28 = int_to_ptr.vmem [resolvable:$true] %s311_s28 }
  0x19   : > { %2097 = sst [smem:[#allocation25_spill]] %s2096_s22  ;;  %p1227_p11 = scmp.ge.s32.totalorder %s1709_s18, 2 }
  0x1a   : > { %p1300_p9 = pneg %p1832_p8  ;;  %s2101_s4 = sld [smem:[#allocation30_spill]] }
  0x1b   : > { %s2081_s20 = smov 128   ;;  %s2082_s23 = smov 8  }
  0x1c   : > { %s309_s25 = sshll.u32 %s2098_s2, 4  ;;  %p1840_p10 = pnand %p1300_p9, %p66_p1  ;;  %s310_s25 = int_to_ptr.hbm [resolvable:$true] %s309_s25 }
  0x1d   : > { %s1714_s24 = smov [#allocation11]   ;;  %s2102_s6 = sld [smem:[#allocation31_spill]] }
  0x1e   : > { %1303 = dma.hbm_to_vmem [thread:$0]  (!%p1840_p10), %s310_s25, 512, %s312_s28, [#allocation9], %s2081_s20, %s2081_s20, %s2082_s23  }
  0x1f   : > { %s328_s27 = sshll.u32 %s1714_s24, 4  ;;  %s2103_s8 = sld [smem:[#allocation32_spill]]  ;;  %s329_s27 = int_to_ptr.vmem [resolvable:$true] %s328_s27 }
  0x20   : > { %s326_s12 = sshll.u32 %s2101_s4, 4  ;;  %s1715_s11 = smov [#allocation13]   ;;  %s327_s12 = int_to_ptr.hbm [resolvable:$true] %s326_s12 }
  0x21   : > { %1306 = dma.hbm_to_vmem [thread:$0]  (!%p1840_p10), %s327_s12, 384, %s329_s27, [#allocation12], %s2081_s20, %s2081_s20, %s2082_s23  }
  0x22   : > { %s345_s24 = sshll.u32 %s1715_s11, 4  ;;  %s1716_s2 = smov [#allocation14]   ;;  %s346_s24 = int_to_ptr.vmem [resolvable:$true] %s345_s24 }
  0x23   : > { %s343_s13 = sshll.u32 %s2102_s6, 4  ;;  %s362_s22 = sshll.u32 %s1716_s2, 4  ;;  %s344_s13 = int_to_ptr.hbm [resolvable:$true] %s343_s13  ;;  %s363_s22 = int_to_ptr.vmem [resolvable:$true] %s362_s22 }
  0x24   : > { %1309 = dma.hbm_to_vmem [thread:$0]  (!%p1840_p10), %s344_s13, 384, %s346_s24, [#allocation12], %s2081_s20, %s2081_s20, %s2082_s23  }
  0x25   : > { %s360_s30 = sshll.u32 %s2103_s8, 4  ;;  %s43_s12 = sadd.s32 1, %s1705_s17  ;;  %s361_s30 = int_to_ptr.hbm [resolvable:$true] %s360_s30 }
  0x26   : > { %1312 = dma.hbm_to_vmem [thread:$0]  (!%p1840_p10), %s361_s30, 512, %s363_s22, [#allocation15], %s2081_s20, %s2081_s20, %s2082_s23  }
  0x27   : > { %s52_s27 = sadd.s32 1, %s1697_s15  ;;  %p45_p12 = scmp.ge.s32.totalorder %s43_s12, 2 }
  0x28   : > { %p59_p13 = scmp.ne.s32.totalorder %s1697_s15, %s1693_s14  ;;  %p60_p0 = scmp.eq.s32.totalorder %s1709_s18, 0 }
  0x29   : > { %p1328_p3 = scmp.lt.s32.totalorder %s1709_s18, 2  ;;  %s2124_s12 = smov (%p45_p12, %s43_s12), 0 }
  0x2a   : > { %2104 = sst [smem:[#allocation26_spill]] %s2124_s12  ;;  %p1882_p5 = por %p60_p0, %p59_p13 }
  0x2b   : > { %p1888_p7 = por %p285_p2, %p59_p13  ;;  %s47_s25 = ssub.s32 %s1705_s17, %s2124_s12 }
  0x2c   : > { %s379_s28 = sand.u32 1, %s1697_s15   ;;  %p50_p9 = scmp.eq.s32.totalorder %s47_s25, 0 }
  0x2d   : > { %s2106_s29 = scalar_select %p1888_p7, 1, 0 }
  0x2e   : > { %s1228_s30 = sshll.u32 %s379_s28, 4  ;;  %s1272_s11 = sshll.u32 %s1705_s17, 4 }
  0x2f   : > { %2107 = sst [smem:[#allocation27_spill]] %s2106_s29  ;;  %s390_s20 = scalar_lea.hbm %s2068_s0, %s1272_s11 }
  0x30   : > { %s1897_s24 = scalar_select %p50_p9, %s1697_s15, %s52_s27  }
  0x31   : > { %s391_s23 = sshll.u32 %s390_s20, 4  ;;  %s383_s4 = scalar_lea.vmem [#allocation5], %s1228_s30  ;;  %s392_s23 = int_to_ptr.hbm [resolvable:$true] %s391_s23 }
  0x32   : > { %2108 = sst [smem:[#allocation28_spill]] %s1897_s24  ;;  %s393_s6 = sshll.u32 %s383_s4, 4  ;;  %s394_s6 = int_to_ptr.vmem [resolvable:$true] %s393_s6 }
  0x33   : > { %p1314_p2 = pnand %p1328_p3, %p1882_p5  ;;  %s403_s8 = sand.u32 1, %s1709_s18  }
  0x34   : > { %s1231_s12 = sshll.u32 %s379_s28, 3  ;;  %s380_s10 = scalar_lea.sflag [#allocation6], %s379_s28 }
  0x35   : > { %s2109_s25 = smov 8   ;;  %s2110_s29 = smov 128  }
  0x36   : > { %1316 = dma.hbm_to_vmem [thread:$0]  (!%p1314_p2), %s392_s23, 256, %s394_s6, %s380_s10, %s2110_s29, %s2110_s29, %s2109_s25  }
  0x37   : > { %s1232_s27 = sshll.u32 %s1705_s17, 3  ;;  %s407_s24 = scalar_lea.vmem [#allocation8], %s1231_s12 }
  0x38   : > { %s415_s15 = sshll.u32 %s407_s24, 4  ;;  %s411_s20 = scalar_lea.hbm %s2069_s1, %s1232_s27  ;;  %s416_s15 = int_to_ptr.vmem [resolvable:$true] %s415_s15 }
  0x39   : > { %s413_s4 = sshll.u32 %s411_s20, 4  ;;  %s404_s13 = scalar_lea.sflag [#allocation9], %s403_s8  ;;  %s414_s4 = int_to_ptr.hbm [resolvable:$true] %s413_s4 }
  0x3a   : > { %1319 = dma.hbm_to_vmem [thread:$0]  (!%p1314_p2), %s414_s4, 128, %s416_s15, %s404_s13  }
  0x3b   : > { %424 = sbr.rel (%p1832_p8) target bundleno = 1139 (0x473), region = 60  ;;  %s1917_s28 = sand.u32 (!%p1832_p8), 1, %s1693_s14  }
  0x3c   : > { %s1234_s6 = sshll.u32 (!%p1832_p8), %s1917_s28, 4  ;;  %s427_s10 = scalar_lea.sflag (!%p1832_p8), [#allocation6], %s1917_s28 }
  0x3d   : > { %s1923_s23 = scalar_lea.vmem (!%p1832_p8), [#allocation5], %s1234_s6 }
  0x40   : > { %1664 = dma.done.wait (%p1819_p4), %s427_s10, 256  }
  0x41   : > { %1666 = vsyncadd (%p1819_p4), %s427_s10, 4294967040  ;;  %s436_s8 = sand.u32 1, %s1810_s19   ;;  %s1235_s15 = sshll.u32 %s1917_s28, 3 }
  0x42   : > { %s437_s26 = scalar_lea.sflag [#allocation9], %s436_s8  ;;  %s440_s12 = scalar_lea.vmem [#allocation8], %s1235_s15 }
  0x43   : > { %1668 = dma.done.wait (%p1819_p4), %s437_s26, 128  }
  0x44   : > { %1670 = vsyncadd (%p1819_p4), %s437_s26, 4294967168 }
  0x45   : > { %1672 = dma.done.wait (%p66_p1), [#allocation9], 512  }
  0x46   : > { %1674 = vsyncadd (%p66_p1), [#allocation9], 4294966784 }
  0x47   : > { %1676 = dma.done.wait (%p66_p1), [#allocation12], 768  }
  0x48   : > { %1678 = vsyncadd (%p66_p1), [#allocation12], 4294966528 }
  0x49   : > { %1680 = dma.done.wait (%p66_p1), [#allocation15], 512  }
  0x4a   : > { %1682 = vsyncadd (%p66_p1), [#allocation15], 4294966784  ;;  %v512_v0 = vld [vmem:[#allocation11 + $0x10] sm:$0xff]  ;;  %v576_v1 = vld [vmem:[#allocation10 + $0x18] sm:$0xff]  ;;  %vm517_vm0 = vcmask 195584   ;;  %vm568_vm1 = vcmask 261120  }
  0x4b   : > { %v511_v2 = vld [vmem:[#allocation11 + $0x8] sm:$0xff]  ;;  %534 = vmatpush.msra.mxu0 %v512_v0  ;;  %1274 = vmatpush.msra.mxu2 %v576_v1  ;;  %v575_v3 = vld [vmem:[#allocation10 + $0x10] sm:$0xff]  ;;  %v510_v4 = vld [vmem:[#allocation11] sm:$0xff]  ;;  %vm615_vm2 = vcmask 64512   ;;  %s1717_s24 = smov 104   ;;  %s1718_s22 = smov 120  }
  0x4c   : > { %v574_v5 = vld [vmem:[#allocation10 + $0x8] sm:$0xff]  ;;  %v509_v6 = vld [vmem:[%s440_s12] sm:$0xff]  ;;  %v573_v7 = vld [vmem:[#allocation10] sm:$0xff]  ;;  %s1719_s25 = smov 112   ;;  %s1720_s11 = smov 8   ;;  %vm802_vm3 = vcmask 130112  }
  0x4d   : > { %535 = vmatpush.msra.mxu0 %v511_v2  ;;  %1275 = vmatpush.msra.mxu2 %v575_v3  ;;  %v572_v8 = vld [vmem:[%s1923_s23 + $0x8] sm:$0xff]  ;;  %v571_v9 = vld [vmem:[%s1923_s23] sm:$0xff]  ;;  %s1721_s20 = smov 16   ;;  %s1722_s4 = smov 24   ;;  %vm906_vm4 = vcmask 195712   ;;  %vm1010_vm5 = vcmask 261312  }
  0x4e   : > { %v1395_v10 = vld [vmem:[%s2073_s5] ss:$0 sm:$0xff]  ;;  %v543_v21 = vld [vmem:[#allocation13 + $0x10] sm:$0xff]  ;;  %v542_v22 = vld [vmem:[#allocation13 + $0x8] sm:$0xff]  ;;  %s1273_s23 = sshll.u32 %s1701_s16, 4  ;;  %s502_s15 = scalar_lea.vmem [#allocation16], %s1234_s6 }
  0x4f   : > { %536 = vmatpush.msra.mxu0 %v510_v4  ;;  %1276 = vmatpush.msra.mxu2 %v574_v5  ;;  %v1396_v13 = vld [vmem:[%s2071_s3] ss:$0 sm:$0xff]  ;;  %v541_v23 = vld [vmem:[#allocation13] sm:$0xff]  ;;  %s2112_s19 = sld [smem:[#allocation33_spill]]  ;;  %s1069_s29 = sshll.u32 %s502_s15, 4  ;;  %s1070_s29 = int_to_ptr.vmem [resolvable:$true] %s1069_s29 }
  0x50   : > { %1241 = vmatmul.msk.f32.vlgmr.msra.gmra.mxu0 %vm517_vm0, %v509_v6  ;;  %561 = vmatpush.msra.mxu1 %v543_v21  ;;  %v1397_v37 = vld [vmem:[%s2075_s7] ss:$0 sm:$0xff] }
  0x51   : > { %1277 = vmatpush.msra.mxu2 %v573_v7  ;;  %600 = vmatpush.msrb.mxu0 %v576_v1 }
  0x52   : > { %1244 = vmatmul.msk.f32.vlgmr.msra.gmra.mxu2 %vm568_vm1, %v572_v8  ;;  %562 = vmatpush.msra.mxu1 %v542_v22 }
  0x53   : > { %601 = vmatpush.msrb.mxu0 %v575_v3 }
  0x54   : > { %563 = vmatpush.msra.mxu1 %v541_v23 }
  0x55   : > { %602 = vmatpush.msrb.mxu0 %v574_v5  ;;  %1242 = vmatmul.msk.f32.vlgmr.msra.gmra.mxu1 %vm517_vm0, %v509_v6  ;;  %s1068_s21 = scalar_lea.hbm %s2112_s19, %s1273_s23  ;;  %s1631_s27 = scalar_lea.hbm %s2112_s19, 32 }
  0x56   : > { %s1071_s30 = sshll.u32 %s1068_s21, 4  ;;  %s1072_s30 = int_to_ptr.hbm [resolvable:$true] %s1071_s30 }
  0x57   : > { %603 = vmatpush.msrb.mxu0 %v573_v7 }
  0x58   : > { %1243 = vmatmul.msk.f32.vlgmr.msrb.gmra.mxu0 %vm568_vm1, %v571_v9 }
  0xcd   : > { %v538_v11 = vpop.f32.mrf.mxu0 }
  0xce   : > { %v539_v12 = vadd.f32 %v1395_v10, %v538_v11 }
  0xd0   : > { %569 = vst.msk [vmem:[#allocation2] sm:$0xff] %vm568_vm1, %v539_v12 }
  0xd2   : > { %v565_v38 = vpop.f32.mrf.mxu1 }
  0xd3   : > { %v566_v39 = vadd.f32 %v1397_v37, %v565_v38 }
  0xd5   : > { %v608_v14 = vpop.f32.mrf.mxu2  ;;  %v605_v15 = vpop.f32.mrf.mxu0  ;;  %570 = vst.msk [vmem:[#allocation3] sm:$0xff] %vm568_vm1, %v566_v39 }
  0xd6   : > { %v609_v16 = vadd.f32 %v1396_v13, %v608_v14  ;;  %v606_v17 = vadd.f32 %v1396_v13, %v605_v15 }
  0xd7   : > { %v909_v18 = vld [vmem:[#allocation2] sm:$0xff] }
  0xd8   : > { %v612_v19 = vmul.f32 0.35355338, %v609_v16  ;;  %v611_v20 = vmul.f32 0.35355338, %v606_v17  ;;  %916 = vrot.lane.b32.xlu2 %v909_v18, %s1717_s24  ;;  %708 = vrot.lane.b32.xlu0 %v909_v18, %s1718_s22 }
  0xd9   : > { %1245 = vmatpush.xpose.msk.msra.mxu3 %vm615_vm2, %v909_v18 }
  0xda   : > { %705 = vrot.lane.b32.xlu1 %v612_v19, %s1718_s22 }
  0xdc   : > { %1246 = vmatmul.msk.f32.vlgmr.msra.gmra.mxu3 %vm615_vm2, %v611_v20  ;;  %v1987_v40 = vld [vmem:[#allocation3] sm:$0xff] }
  0xdd   : > { %691 = vmatpush.msra.mxu0 %v1987_v40 }
  0xe0   : > { %807 = vrot.lane.b32.xlu2 %v611_v20, %s1719_s25  ;;  %703 = vrot.lane.b32.xlu0 %v611_v20, %s1718_s22 }
  0xe2   : > { %812 = vrot.lane.b32.xlu1 %v909_v18, %s1719_s25 }
  0xe4   : > { %1247 = vmatmul.msk.f32.gmra.mxu3 %vm615_vm2, %v612_v19 }
  0xe8   : > { %913 = vrot.lane.b32.xlu2 %v612_v19, %s1717_s24  ;;  %911 = vrot.lane.b32.xlu0 %v611_v20, %s1717_s24 }
  0xea   : > { %809 = vrot.lane.b32.xlu1 %v612_v19, %s1719_s25 }
 0x132   : > { %v917_v25 = vpop.permute.xlu2 %916 }
 0x13a   : > { %v808_v29 = vpop.permute.xlu2 %807 }
 0x142   : > { %v914_v36 = vpop.permute.xlu2 %913 }
 0x14a   : > { %v709_v24 = vpop.permute.xlu0 %708 }
 0x14b   : > { %1250 = vmatpush.xpose.msk.msrb.mxu1 %vm615_vm2, %v709_v24 }
 0x14c   : > { %v706_v26 = vpop.permute.xlu1 %705 }
 0x14f   : > { %1260 = vmatpush.xpose.msk.msra.mxu1 %vm615_vm2, %v917_v25 }
 0x152   : > { %v704_v27 = vpop.permute.xlu0 %703 }
 0x153   : > { %1251 = vmatmul.msk.f32.vlgmr.msrb.gmra.mxu1 %vm615_vm2, %v704_v27 }
 0x154   : > { %v813_v28 = vpop.permute.xlu1 %812 }
 0x155   : > { %1255 = vmatpush.xpose.msk.msrb.mxu2 %vm615_vm2, %v813_v28 }
 0x158   : > { %1256 = vmatmul.msk.f32.vlgmr.msrb.gmra.mxu2 %vm615_vm2, %v808_v29 }
 0x15a   : > { %v912_v33 = vpop.permute.xlu0 %911 }
 0x15b   : > { %1252 = vmatmul.msk.f32.gmra.mxu1 %vm615_vm2, %v706_v26 }
 0x15c   : > { %v810_v30 = vpop.permute.xlu1 %809 }
 0x15f   : > { %v642_v31 = vpop.f32.mrf.mxu3 }
 0x160   : > { %1257 = vmatmul.msk.f32.gmra.mxu2 %vm615_vm2, %v810_v30  ;;  %v648_v32 = vsel %vm615_vm2, %v642_v31, -inf }
 0x161   : > { %649 = vmax.xlane.f32.xlu1 %v648_v32 }
 0x163   : > { %1261 = vmatmul.msk.f32.vlgmr.msra.gmra.mxu1 %vm615_vm2, %v912_v33 }
 0x167   : > { %v645_v34 = vpop.f32.mrf.mxu3 }
 0x168   : > { %v651_v35 = vsel %vm615_vm2, %v645_v34, -inf }
 0x169   : > { %652 = vmax.xlane.f32.xlu2 %v651_v35 }
 0x16b   : > { %1262 = vmatmul.msk.f32.gmra.mxu1 %vm615_vm2, %v914_v36 }
 0x1d0   : > { %v733_v41 = vpop.f32.mrf.mxu1 }
 0x1d1   : > { %v739_v42 = vsel %vm615_vm2, %v733_v41, -inf }
 0x1d2   : > { %740 = vmax.xlane.f32.xlu0 %v739_v42 }
 0x1d4   : > { %v650_v43 = vpop.xlane.xlu1 %649 }
 0x1d5   : > { %v654_v44 = vsub.f32 %v642_v31, %v650_v43 }
 0x1d7   : > { %v656_v45 = vmul.f32 1.442695, %v654_v44 }
 0x1d8   : > { %v736_v46 = vpop.f32.mrf.mxu1 }
 0x1d9   : > { %1399 = vpow2.f32 %v656_v45  ;;  %v742_v47 = vsel %vm615_vm2, %v736_v46, -inf }
 0x1da   : > { %743 = vmax.xlane.f32.xlu2 %v742_v47 }
 0x1db   : > { %v837_v48 = vpop.f32.mrf.mxu2 }
 0x1dc   : > { %v843_v49 = vsel %vm615_vm2, %v837_v48, -inf  ;;  %v653_v50 = vpop.xlane.xlu2 %652 }
 0x1dd   : > { %844 = vmax.xlane.f32.xlu1 %v843_v49  ;;  %v655_v52 = vsub.f32 %v645_v34, %v653_v50 }
 0x1df   : > { %v1400_v51 = vpop.eup %1399  ;;  %v658_v56 = vmul.f32 1.442695, %v655_v52 }
 0x1e0   : > { %v941_v53 = vpop.f32.mrf.mxu1  ;;  %v660_v55 = vsel %vm615_vm2, %v1400_v51, 0.0 }
 0x1e1   : > { %v947_v54 = vsel %vm615_vm2, %v941_v53, -inf  ;;  %1401 = vpow2.f32 %v658_v56 }
 0x1e2   : > { %948 = vmax.xlane.f32.xlu0 %v947_v54  ;;  %661 = vadd.xlane.f32.xlu2 %v660_v55 }
 0x1e3   : > { %v840_v57 = vpop.f32.mrf.mxu2 }
 0x1e4   : > { %v846_v59 = vsel %vm615_vm2, %v840_v57, -inf }
 0x1e7   : > { %v1402_v61 = vpop.eup %1401 }
 0x1e8   : > { %v944_v58 = vpop.f32.mrf.mxu1  ;;  %v663_v62 = vsel %vm615_vm2, %v1402_v61, 0.0 }
 0x1e9   : > { %v950_v60 = vsel %vm615_vm2, %v944_v58, -inf }
 0x1ea   : > { %847 = vmax.xlane.f32.xlu0 %v846_v59  ;;  %951 = vmax.xlane.f32.xlu2 %v950_v60 }
 0x1f2   : > { %664 = vadd.xlane.f32.xlu2 %v663_v62 }
 0x1f6   : > { %762 = vrot.lane.b32.xlu1 %v1987_v40, %s1718_s22  ;;  %s1625_s22 = sshra.s32 %s1072_s30, 4  ;;  %s1626_s22 = int_to_ptr.hbm [resolvable:$true] %s1625_s22 }
 0x1f7   : > { %p1632_p10 = scmp.lt.s32.totalorder %s1626_s22, %s2112_s19 }
 0x245   : > { %v741_v63 = vpop.xlane.xlu0 %740 }
 0x246   : > { %v745_v0 = vsub.f32 %v733_v41, %v741_v63 }
 0x248   : > { %v747_v1 = vmul.f32 1.442695, %v745_v0 }
 0x24a   : > { %1403 = vpow2.f32 %v747_v1  ;;  %v1018_v1 = vld [vmem:[#allocation14 + $0x18] sm:$0xff] }
 0x24b   : > { %1041 = vmatpush.msra.mxu2 %v1018_v1 }
 0x24d   : > { %v744_v2 = vpop.xlane.xlu2 %743 }
 0x24e   : > { %v746_v3 = vsub.f32 %v736_v46, %v744_v2  ;;  %v1017_v2 = vld [vmem:[#allocation14 + $0x10] sm:$0xff] }
 0x24f   : > { %1042 = vmatpush.msra.mxu2 %v1017_v2 }
 0x250   : > { %v1404_v4 = vpop.eup %1403  ;;  %v749_v5 = vmul.f32 1.442695, %v746_v3  ;;  %v845_v6 = vpop.xlane.xlu1 %844  ;;  %v1016_v3 = vld [vmem:[#allocation14 + $0x8] sm:$0xff] }
 0x251   : > { %v849_v7 = vsub.f32 %v837_v48, %v845_v6  ;;  %v751_v8 = vsel %vm615_vm2, %v1404_v4, 0.0  ;;  %1043 = vmatpush.msra.mxu2 %v1016_v3 }
 0x252   : > { %1405 = vpow2.f32 %v749_v5  ;;  %752 = vadd.xlane.f32.xlu1 %v751_v8 }
 0x253   : > { %v851_v9 = vmul.f32 1.442695, %v849_v7 }
 0x255   : > { %1407 = vpow2.f32 %v851_v9  ;;  %v949_v10 = vpop.xlane.xlu0 %948  ;;  %v662_v11 = vpop.xlane.xlu2 %661 }
 0x256   : > { %v953_v12 = vsub.f32 %v941_v53, %v949_v10  ;;  %1409 = vrcp.f32 %v662_v11 }
 0x258   : > { %v1406_v13 = vpop.eup %1405  ;;  %v955_v14 = vmul.f32 1.442695, %v953_v12  ;;  %v1398_v12 = vld [vmem:[%s2077_s9] ss:$0 sm:$0xff] }
 0x259   : > { %v754_v15 = vsel %vm615_vm2, %v1406_v13, 0.0 }
 0x25a   : > { %1411 = vpow2.f32 %v955_v14  ;;  %755 = vadd.xlane.f32.xlu0 %v754_v15 }
 0x25b   : > { %v1408_v16 = vpop.eup %1407 }
 0x25c   : > { %v1410_v17 = vpop.eup %1409  ;;  %v855_v18 = vsel %vm615_vm2, %v1408_v16, 0.0 }
 0x25d   : > { %v668_v19 = vmul.f32 %v1410_v17, %v1400_v51  ;;  %856 = vadd.xlane.f32.xlu2 %v855_v18  ;;  %v952_v20 = vpop.xlane.xlu2 %951  ;;  %v848_v21 = vpop.xlane.xlu0 %847 }
 0x25e   : > { %v954_v22 = vsub.f32 %v944_v58, %v952_v20  ;;  %v850_v25 = vsub.f32 %v840_v57, %v848_v21 }
 0x25f   : > { %1248 = vmatmul.msk.f32.vlgmr.msra.gmra.mxu0 %vm615_vm2, %v668_v19 }
 0x260   : > { %v1412_v23 = vpop.eup %1411  ;;  %v957_v24 = vmul.f32 1.442695, %v954_v22  ;;  %v853_v27 = vmul.f32 1.442695, %v850_v25 }
 0x261   : > { %v959_v26 = vsel %vm615_vm2, %v1412_v23, 0.0 }
 0x262   : > { %960 = vadd.xlane.f32.xlu0 %v959_v26  ;;  %1413 = vpow2.f32 %v957_v24 }
 0x265   : > { %v665_v28 = vpop.xlane.xlu2 %664 }
 0x266   : > { %1415 = vrcp.f32 %v665_v28 }
 0x267   : > { %1417 = vpow2.f32 %v853_v27 }
 0x268   : > { %v763_v29 = vpop.permute.xlu1 %762  ;;  %v1414_v30 = vpop.eup %1413 }
 0x269   : > { %786 = vmatpush.msrb.mxu3 %v763_v29  ;;  %v962_v31 = vsel %vm615_vm2, %v1414_v30, 0.0 }
 0x26a   : > { %963 = vadd.xlane.f32.xlu0 %v962_v31 }
 0x26b   : > { %866 = vrot.lane.b32.xlu1 %v1987_v40, %s1719_s25  ;;  %s1627_s25 = scalar_lea.hbm %s1626_s22, 16 }
 0x26c   : > { %v1416_v32 = vpop.eup %1415  ;;  %p1628_p1 = scmp.ne.s32.totalorder %s1626_s22, %s1627_s25  ;;  %p1633_p12 = scmp.lt.s32.totalorder %s1631_s27, %s1627_s25 }
 0x26d   : > { %v669_v33 = vmul.f32 %v1416_v32, %v1402_v61  ;;  %v1418_v34 = vpop.eup %1417 }
 0x26e   : > { %v858_v35 = vsel %vm615_vm2, %v1418_v34, 0.0  ;;  %p1629_p4 = pnand %p1628_p1, %p1888_p7  ;;  %p1634_p13 = por %p1633_p12, %p1632_p10 }
 0x26f   : > { %1249 = vmatmul.msk.f32.gmra.mxu0 %vm615_vm2, %v669_v33 }
 0x270   : > { %p1630_p8 = pneg %p1629_p4 }
 0x272   : > { %859 = vadd.xlane.f32.xlu0 %v858_v35  ;;  %p1635_p0 = pnand %p1634_p13, %p1630_p8 }
 0x275   : > { %970 = vrot.lane.b32.xlu2 %v1987_v40, %s1717_s24  ;;  %s1055_s24 = scalar_lea.sflag [#allocation7], %s1917_s28 }
 0x2c5   : > { %v753_v36 = vpop.xlane.xlu1 %752 }
 0x2c6   : > { %1419 = vrcp.f32 %v753_v36 }
 0x2cc   : > { %v1420_v37 = vpop.eup %1419 }
 0x2cd   : > { %v756_v38 = vpop.xlane.xlu0 %755  ;;  %v759_v39 = vmul.f32 %v1420_v37, %v1404_v4  ;;  %v1015_v4 = vld [vmem:[#allocation14] sm:$0xff] }
 0x2ce   : > { %1421 = vrcp.f32 %v756_v38  ;;  %1044 = vmatpush.msra.mxu2 %v1015_v4 }
 0x2cf   : > { %1253 = vmatmul.msk.f32.vlgmr.msrb.gmra.mxu3 %vm615_vm2, %v759_v39 }
 0x2d0   : > { %v857_v41 = vpop.xlane.xlu2 %856 }
 0x2d1   : > { %1423 = vrcp.f32 %v857_v41 }
 0x2d4   : > { %v1422_v42 = vpop.eup %1421 }
 0x2d5   : > { %v961_v43 = vpop.xlane.xlu0 %960  ;;  %v760_v44 = vmul.f32 %v1422_v42, %v1406_v13 }
 0x2d6   : > { %1425 = vrcp.f32 %v961_v43 }
 0x2d7   : > { %1254 = vmatmul.msk.f32.gmra.mxu3 %vm615_vm2, %v760_v44  ;;  %v1424_v46 = vpop.eup %1423 }
 0x2d8   : > { %v971_v45 = vpop.permute.xlu2 %970  ;;  %v863_v48 = vmul.f32 %v1424_v46, %v1408_v16 }
 0x2d9   : > { %994 = vmatpush.msra.mxu3 %v971_v45 }
 0x2dc   : > { %v1426_v40 = vpop.eup %1425  ;;  %v693_v47 = vpop.f32.mrf.mxu0 }
 0x2dd   : > { %v967_v49 = vmul.f32 %v1426_v40, %v1412_v23  ;;  %699 = vst.msk [vmem:[#allocation4] sm:$0xff] %vm615_vm2, %v693_v47  ;;  %v867_v50 = vpop.permute.xlu1 %866  ;;  %v964_v51 = vpop.xlane.xlu0 %963 }
 0x2de   : > { %890 = vmatpush.msrb.mxu0 %v867_v50  ;;  %1427 = vrcp.f32 %v964_v51 }
 0x2df   : > { %1258 = vmatmul.msk.f32.vlgmr.msrb.gmra.mxu0 %vm615_vm2, %v863_v48  ;;  %1263 = vmatmul.msk.f32.vlgmr.msra.gmra.mxu3 %vm615_vm2, %v967_v49 }
 0x2e4   : > { %v1428_v52 = vpop.eup %1427 }
 0x2e5   : > { %v860_v53 = vpop.xlane.xlu0 %859  ;;  %v968_v54 = vmul.f32 %v1428_v52, %v1414_v30 }
 0x2e6   : > { %1429 = vrcp.f32 %v860_v53 }
 0x2e7   : > { %1264 = vmatmul.msk.f32.gmra.mxu3 %vm615_vm2, %v968_v54 }
 0x2ec   : > { %v696_v55 = vpop.f32.mrf.mxu0  ;;  %v1430_v56 = vpop.eup %1429 }
 0x2ed   : > { %700 = vst.msk [vmem:[#allocation4 + $0x8] sm:$0xff] %vm615_vm2, %v696_v55  ;;  %v864_v57 = vmul.f32 %v1430_v56, %v1418_v34 }
 0x2ef   : > { %1259 = vmatmul.msk.f32.gmra.mxu0 %vm615_vm2, %v864_v57 }
 0x352   : > { %v788_v58 = vpop.f32.mrf.mxu3 }
 0x353   : > { %796 = vrot.lane.b32.xlu0 %v788_v58, %s1720_s11 }
 0x35a   : > { %v791_v59 = vpop.f32.mrf.mxu3 }
 0x35b   : > { %798 = vrot.lane.b32.xlu2 %v791_v59, %s1720_s11 }
 0x35c   : > { %v892_v60 = vpop.f32.mrf.mxu0 }
 0x35d   : > { %900 = vrot.lane.b32.xlu1 %v892_v60, %s1721_s20 }
 0x362   : > { %v996_v61 = vpop.f32.mrf.mxu3 }
 0x365   : > { %1004 = vrot.lane.b32.xlu1 %v996_v61, %s1722_s4 }
 0x36a   : > { %v999_v62 = vpop.f32.mrf.mxu3 }
 0x36b   : > { %1006 = vrot.lane.b32.xlu0 %v999_v62, %s1722_s4 }
 0x36c   : > { %v895_v63 = vpop.f32.mrf.mxu0 }
 0x36d   : > { %902 = vrot.lane.b32.xlu1 %v895_v63, %s1721_s20 }
 0x3b5   : > { %v799_v0 = vpop.permute.xlu2 %798 }
 0x3b6   : > { %804 = vst.msk [vmem:[#allocation4 + $0x8] sm:$0xff] %vm802_vm3, %v799_v0 }
 0x3c5   : > { %v797_v5 = vpop.permute.xlu0 %796 }
 0x3c6   : > { %803 = vst.msk [vmem:[#allocation4] sm:$0xff] %vm802_vm3, %v797_v5 }
 0x3cf   : > { %v901_v6 = vpop.permute.xlu1 %900 }
 0x3d0   : > { %907 = vst.msk [vmem:[#allocation4] sm:$0xff] %vm906_vm4, %v901_v6 }
 0x3d7   : > { %v1005_v7 = vpop.permute.xlu1 %1004 }
 0x3d8   : > { %1011 = vst.msk [vmem:[#allocation4] sm:$0xff] %vm1010_vm5, %v1005_v7 }
 0x3dd   : > { %v1007_v10 = vpop.permute.xlu0 %1006 }
 0x3df   : > { %v1013_v8 = vld [vmem:[#allocation4] sm:$0xff]  ;;  %v903_v9 = vpop.permute.xlu1 %902 }
 0x3e0   : > { %1265 = vmatmul.msk.f32.vlgmr.msra.gmra.mxu2 %vm568_vm1, %v1013_v8  ;;  %908 = vst.msk [vmem:[#allocation4 + $0x8] sm:$0xff] %vm906_vm4, %v903_v9 }
 0x3e1   : > { %1012 = vst.msk [vmem:[#allocation4 + $0x8] sm:$0xff] %vm1010_vm5, %v1007_v10 }
 0x3e8   : > { %v1014_v11 = vld [vmem:[#allocation4 + $0x8] sm:$0xff] }
 0x3e9   : > { %1266 = vmatmul.msk.f32.gmra.mxu2 %vm568_vm1, %v1014_v11 }
 0x463   : > { %v1046_v13 = vpop.f32.mrf.mxu2 }
 0x464   : > { %v1047_v14 = vadd.f32 %v1398_v12, %v1046_v13 }
 0x466   : > { %1052 = vst [vmem:[%s502_s15] sm:$0xff] %v1047_v14 }
 0x46c   : > { %v1049_v15 = vpop.f32.mrf.mxu2 }
 0x46d   : > { %v1050_v16 = vadd.f32 %v1398_v12, %v1049_v15 }
 0x46f   : > { %1053 = vst [vmem:[%s502_s15 + $0x8] sm:$0xff] %v1050_v16 }
 0x470   : > { %1638 = shalt.err (!%p1635_p0)
}
 0x471   : > { %s1723_s28 = smov 128  }
 0x472   : > { %1298 = dma.vmem_to_hbm [thread:$0]  (%p1888_p7), %s1070_s29, 256, %s1072_s30, %s1055_s24, %s1723_s28, %s1723_s28, %s1720_s11  }
 0x473 PF: > { %s2113_s4 = sld [smem:[#allocation23_spill]]  ;;  %p1321_p3 = pnand %p1227_p11, %p1824_p6 }
 0x475   : > { %p1322_p5 = pneg %p1321_p3 }
 0x479   : > { %s1086_s10 = sand.u32 1, %s2113_s4  }
 0x47a   : > { %s1087_s23 = scalar_lea.sflag [#allocation7], %s1086_s10 }
 0x47b   : > { %1684 = dma.done.wait (%p1322_p5), %s1087_s23, 256  }
 0x47c   : > { %1686 = vsyncadd (%p1322_p5), %s1087_s23, 4294967040  ;;  %s31_s18 = sadd.s32 1, %s1709_s18   ;;  %s2115_s15 = sld [smem:[#allocation24_spill]] }
 0x47d   : > { %p28_p9 = scmp.ge.s32.totalorder %s31_s18, 4   ;;  %s2116_s8 = sld [smem:[#allocation28_spill]] }
 0x47e   : > { %s2117_s11 = sld [smem:[#allocation26_spill]]  ;;  %s2118_s13 = smov %s1693_s14 }
 0x47f   : > { %s2121_s16 = smov %s1705_s17 }
 0x480   :  { %30 = sbr.rel (!%p28_p9) target bundleno = 16 (0x10), region = 138 }
 0x482   : > { %s2119_s14 = smov %s2115_s15 }
 0x483   : > { %s2120_s15 = smov %s2116_s8 }
 0x484   : > { %s2122_s17 = smov %s2117_s11 }
 0x485   :  { %1093 = vsyncpa [#allocation6], 1 }
 0x486   :  { %1095 = vsyncpa [#allocation6 + $0x1], 1 }
 0x487   :  { %1096 = vsyncpa [#allocation9], 1 }
 0x488   :  { %1098 = vsyncpa [#allocation9 + $0x1], 1 }
 0x489   :  { %1099 = vsyncpa [#allocation12], 1 }
 0x48a   :  { %1100 = vsyncpa [#allocation15], 1 }
 0x48b   :  { %1101 = vsyncpa [#allocation7], 1 }
 0x48c   :  { %1103 = vsyncpa [#allocation7 + $0x1], 1 }

</bundles_post_ra>
